<compile_context>
chip_gen: v7x
topology: tpu7x:2x2x1
jax: 0.10.0
libtpu: 0.0.40
codegen_flags: <defaults>
</compile_context>

<pallas_src>
import functools
import math

import jax
import jax.numpy as jnp
from jax.experimental import pallas as pl
from jax.experimental.pallas import tpu as pltpu

# ----------------------------- model hyper-params (small, synthetic) ----------
BATCH = 2
TEXT_SEQ = 8          # stands in for the 256 text positions of the real model
VIDEO_SEQ = 4
FRAME_DIM = 16        # raw video frame feature dim
HIDDEN = 128          # lane-dense (multiple of 128)
NUM_HEADS = 2
HEAD_DIM = HIDDEN // NUM_HEADS
INTERMEDIATE = 512
NUM_LAYERS = 2
VOCAB = 128           # lane-dense decoder output
MAX_POS = 64
LN_EPS = 1e-12


# ----------------------------- in-kernel helpers ------------------------------
def _gelu(x):
    # TODO(synk): PyTorch gelu uses the exact erf formulation; tanh approximation
    # is used here for robust Mosaic lowering (EUP tanh path).
    return jax.nn.gelu(x, approximate=True)


def _mm(a, w):
    """MXU matmul: bf16 inputs, f32 accumulation (keeps epilogue math in f32)."""
    return jnp.dot(a.astype(jnp.bfloat16), w.astype(jnp.bfloat16),
                   preferred_element_type=jnp.float32)


def _ln(x, g, b, eps=LN_EPS):
    """LayerNorm with stats in f32. g/b are (1, N)."""
    mu = jnp.mean(x, axis=-1, keepdims=True)
    var = jnp.mean((x - mu) ** 2, axis=-1, keepdims=True)
    return (x - mu) * jax.lax.rsqrt(var + eps) * g + b


# ----------------------------- small standalone kernels -----------------------
def linear_kernel(x_ref, w_ref, b_ref, o_ref):
    o_ref[...] = _mm(x_ref[...], w_ref[...]) + b_ref[...]


def linear(x, w, b2d):
    """x: [M, K], w: [K, N], b2d: [1, N] -> [M, N]. Whole-array VMEM blocks."""
    M = x.shape[0]
    N = w.shape[1]
    return pl.pallas_call(
        linear_kernel,
        out_shape=jax.ShapeDtypeStruct((M, N), jnp.float32),
    )(x, w, b2d)


def layernorm_kernel(x_ref, g_ref, b_ref, o_ref):
    o_ref[...] = _ln(x_ref[...], g_ref[...], b_ref[...])


def layernorm(x, g2d, b2d):
    return pl.pallas_call(
        layernorm_kernel,
        out_shape=jax.ShapeDtypeStruct(x.shape, jnp.float32),
    )(x, g2d, b2d)


# ----------------------------- fused encoder layer kernel ---------------------
def encoder_layer_kernel(h_ref, m_ref,
                         wqkv_ref, bqkv_ref, wo_ref, bo_ref,
                         ln1g_ref, ln1b_ref,
                         wi_ref, bi_ref, wf_ref, bf_ref,
                         ln2g_ref, ln2b_ref,
                         o_ref, ctx_scratch,
                         *, num_heads, head_dim, scale):
    x = h_ref[...][0]          # [S, H]  f32
    m = m_ref[...][0]          # [1, S]  additive attention mask

    H = x.shape[-1]

    # fused Q/K/V projection: one [S, H] x [H, 3H] matmul
    qkv = _mm(x, wqkv_ref[...]) + bqkv_ref[...]          # [S, 3H]
    q = qkv[:, :H]
    k = qkv[:, H:2 * H]
    v = qkv[:, 2 * H:]

    # per-head attention with heads folded along the lane dim (static slices)
    for hh in range(num_heads):
        lo = hh * head_dim
        hi = lo + head_dim
        qh = q[:, lo:hi]
        kh = k[:, lo:hi]
        vh = v[:, lo:hi]
        s = jnp.dot(qh, kh.T, preferred_element_type=jnp.float32) * scale + m
        s = s - jnp.max(s, axis=-1, keepdims=True)
        p = jnp.exp(s)
        inv = pl.reciprocal(jnp.sum(p, axis=-1, keepdims=True), approx=True)
        p = p * inv
        ctx_scratch[:, lo:hi] = jnp.dot(p, vh, preferred_element_type=jnp.float32)

    ctx = ctx_scratch[...]                                # [S, H]

    # output projection + residual + LayerNorm (fused)
    attn_out = _mm(ctx, wo_ref[...]) + bo_ref[...]
    h1 = _ln(x + attn_out, ln1g_ref[...], ln1b_ref[...])

    # FFN: intermediate GELU + output matmul + residual + LayerNorm (fused)
    inter = _gelu(_mm(h1, wi_ref[...]) + bi_ref[...])
    ffn = _mm(inter, wf_ref[...]) + bf_ref[...]
    h2 = _ln(h1 + ffn, ln2g_ref[...], ln2b_ref[...])

    o_ref[...] = h2[None, :, :]


def _resident(shape):
    """BlockSpec for a weight that stays resident in VMEM across the grid."""
    n = len(shape)
    return pl.BlockSpec(shape, lambda b: (0,) * n)


def encoder_layer(p, h, mask_add):
    """h: [B, S, H]; mask_add: [B, 1, S] additive (-1e4 on padding)."""
    B, S, H = h.shape
    kern = functools.partial(
        encoder_layer_kernel,
        num_heads=NUM_HEADS, head_dim=HEAD_DIM, scale=1.0 / math.sqrt(HEAD_DIM),
    )
    return pl.pallas_call(
        kern,
        out_shape=jax.ShapeDtypeStruct((B, S, H), jnp.float32),
        grid=(B,),
        in_specs=[
            pl.BlockSpec((1, S, H), lambda b: (b, 0, 0)),   # hidden states
            pl.BlockSpec((1, 1, S), lambda b: (b, 0, 0)),   # additive mask
            _resident((H, 3 * H)), _resident((1, 3 * H)),   # wqkv, bqkv
            _resident((H, H)), _resident((1, H)),           # wo, bo
            _resident((1, H)), _resident((1, H)),           # ln1 g, b
            _resident((H, INTERMEDIATE)), _resident((1, INTERMEDIATE)),  # wi, bi
            _resident((INTERMEDIATE, H)), _resident((1, H)),             # wf, bf
            _resident((1, H)), _resident((1, H)),           # ln2 g, b
        ],
        out_specs=pl.BlockSpec((1, S, H), lambda b: (b, 0, 0)),
        scratch_shapes=[pltpu.VMEM((S, H), jnp.float32)],
        compiler_params=pltpu.CompilerParams(
            dimension_semantics=("parallel",),
        ),
    )(h, mask_add,
      p["wqkv"], p["bqkv"], p["wo"], p["bo"],
      p["ln1_g"], p["ln1_b"], p["wi"], p["bi"], p["wf"], p["bf"],
      p["ln2_g"], p["ln2_b"])


# ----------------------------- fused MLM head kernel --------------------------
def mlm_head_kernel(x_ref, dw_ref, db_ref, g_ref, b_ref, decw_ref, decb_ref, o_ref):
    t = _gelu(_mm(x_ref[...], dw_ref[...]) + db_ref[...])
    t = _ln(t, g_ref[...], b_ref[...])
    o_ref[...] = _mm(t, decw_ref[...]) + decb_ref[...]


def mlm_head(p, h_text):
    """h_text: [B, St, H] (already sliced to text positions) -> [B, St, VOCAB]."""
    B, St, H = h_text.shape
    x = h_text.reshape(B * St, H)
    logits = pl.pallas_call(
        mlm_head_kernel,
        out_shape=jax.ShapeDtypeStruct((B * St, VOCAB), jnp.float32),
    )(x, p["dense_w"], p["dense_b"], p["ln_g"], p["ln_b"], p["dec_w"], p["dec_b"])
    return logits.reshape(B, St, VOCAB)


# ----------------------------- model pieces (glue + kernel calls) -------------
def multimodal_encoder(params, text_ids, text_mask, video_feat, video_mask):
    B, St = text_ids.shape
    Sv = video_feat.shape[1]
    H = HIDDEN

    # text embeddings (gathers are JAX glue)
    tok = params["word_emb"][text_ids]                       # [B, St, H]
    pos_t = params["pos_emb"][:St]                           # [St, H]
    typ_t = params["type_emb"][0]                            # [H]
    text_emb = tok + pos_t[None, :, :] + typ_t[None, None, :]

    # video embeddings: frame feature projection (Pallas matmul) + pos/type
    vproj = linear(
        video_feat.reshape(B * Sv, FRAME_DIM),
        params["video_fc_w"], params["video_fc_b"],
    ).reshape(B, Sv, H)
    pos_v = params["pos_emb"][St:St + Sv]
    typ_v = params["type_emb"][1]
    video_emb = vproj + pos_v[None, :, :] + typ_v[None, None, :]

    # concat [text ; video] along the sequence axis
    emb = jnp.concatenate([text_emb, video_emb], axis=1)     # [B, S, H]
    S = St + Sv
    emb = layernorm(
        emb.reshape(B * S, H), params["emb_ln_g"], params["emb_ln_b"]
    ).reshape(B, S, H)

    mask = jnp.concatenate(
        [text_mask.astype(jnp.float32), video_mask.astype(jnp.float32)], axis=1
    )                                                        # [B, S]
    mask_add = ((1.0 - mask) * -10000.0)[:, None, :]         # [B, 1, S]

    h = emb
    for layer in params["layers"]:
        h = encoder_layer(layer, h, mask_add)
    return h


def uni_bert_forward(params, video_feature, video_mask, text_input_ids, text_mask,
                     return_mlm=False):
    enc = multimodal_encoder(params, text_input_ids, text_mask, video_feature, video_mask)
    if return_mlm:
        # mirrors `self.cls(encoder_outputs)[:, :256, :]`; the head is per-token,
        # so slicing to text positions BEFORE the decoder matmul is equivalent
        # and skips the video positions' decoder FLOPs/HBM traffic.
        logits = mlm_head(params["cls"], enc[:, :TEXT_SEQ, :])
        return enc, logits
    return enc, None


# ----------------------------- deterministic parameter init -------------------
def init_params(key):
    def nrm(k, shape, scale=0.02):
        return (scale * jax.random.normal(k, shape)).astype(jnp.float32)

    keys = iter(jax.random.split(key, 256))
    params = {
        "word_emb": nrm(next(keys), (VOCAB, HIDDEN)),
        "pos_emb": nrm(next(keys), (MAX_POS, HIDDEN)),
        "type_emb": nrm(next(keys), (2, HIDDEN)),
        "emb_ln_g": jnp.ones((1, HIDDEN), jnp.float32),
        "emb_ln_b": jnp.zeros((1, HIDDEN), jnp.float32),
        "video_fc_w": nrm(next(keys), (FRAME_DIM, HIDDEN)),
        "video_fc_b": jnp.zeros((1, HIDDEN), jnp.float32),
        "layers": [],
        "cls": {},
    }
    for _ in range(NUM_LAYERS):
        layer = {
            # fused Q|K|V weight [H, 3H] and bias [1, 3H]
            "wqkv": nrm(next(keys), (HIDDEN, 3 * HIDDEN)),
            "bqkv": jnp.zeros((1, 3 * HIDDEN), jnp.float32),
            "wo": nrm(next(keys), (HIDDEN, HIDDEN)),
            "bo": jnp.zeros((1, HIDDEN), jnp.float32),
            "ln1_g": jnp.ones((1, HIDDEN), jnp.float32),
            "ln1_b": jnp.zeros((1, HIDDEN), jnp.float32),
            "wi": nrm(next(keys), (HIDDEN, INTERMEDIATE)),
            "bi": jnp.zeros((1, INTERMEDIATE), jnp.float32),
            "wf": nrm(next(keys), (INTERMEDIATE, HIDDEN)),
            "bf": jnp.zeros((1, HIDDEN), jnp.float32),
            "ln2_g": jnp.ones((1, HIDDEN), jnp.float32),
            "ln2_b": jnp.zeros((1, HIDDEN), jnp.float32),
        }
        params["layers"].append(layer)
    params["cls"] = {
        "dense_w": nrm(next(keys), (HIDDEN, HIDDEN)),
        "dense_b": jnp.zeros((1, HIDDEN), jnp.float32),
        "ln_g": jnp.ones((1, HIDDEN), jnp.float32),
        "ln_b": jnp.zeros((1, HIDDEN), jnp.float32),
        "dec_w": nrm(next(keys), (HIDDEN, VOCAB)),
        "dec_b": jnp.zeros((1, VOCAB), jnp.float32),
    }
    return params


# ----------------------------- main --------------------------------------------
if __name__ == "__main__":
    root = jax.random.PRNGKey(0)
    k_param, k_ids, k_vid = jax.random.split(root, 3)

    params = init_params(k_param)

    text_input_ids = jax.random.randint(k_ids, (BATCH, TEXT_SEQ), 0, VOCAB, dtype=jnp.int32)
    # masks: last text token of sample 1 and last frame of sample 0 are padding
    text_mask = jnp.ones((BATCH, TEXT_SEQ), jnp.float32).at[1, -1].set(0.0)
    video_mask = jnp.ones((BATCH, VIDEO_SEQ), jnp.float32).at[0, -1].set(0.0)
    video_feature = jax.random.normal(k_vid, (BATCH, VIDEO_SEQ, FRAME_DIM), jnp.float32)

    enc, mlm_logits = uni_bert_forward(
        params, video_feature, video_mask, text_input_ids, text_mask, return_mlm=True
    )
    enc = jax.block_until_ready(enc)
    mlm_logits = jax.block_until_ready(mlm_logits)

    assert enc.shape == (BATCH, TEXT_SEQ + VIDEO_SEQ, HIDDEN)
    assert mlm_logits.shape == (BATCH, TEXT_SEQ, VOCAB)
    assert bool(jnp.all(jnp.isfinite(enc))) and bool(jnp.all(jnp.isfinite(mlm_logits)))

    # also exercise the return_mlm=False branch (returns (hidden, None))
    enc2, none_out = uni_bert_forward(
        params, video_feature, video_mask, text_input_ids, text_mask, return_mlm=False
    )
    jax.block_until_ready(enc2)
    assert none_out is None

    print("KERNEL_OK")
</pallas_src>

<mosaic_0001>
module attributes {stable_mosaic.version = 11 : i64} {
  func.func @linear_kernel(%arg0: memref<8x16xf32, #tpu.memory_space<vmem>>, %arg1: memref<16x128xf32, #tpu.memory_space<vmem>>, %arg2: memref<1x128xf32, #tpu.memory_space<vmem>>, %arg3: memref<8x128xf32, #tpu.memory_space<vmem>>) attributes {dimension_semantics = [], scalar_prefetch = 0 : i64, scratch_operands = 0 : i64, tpu.core_type = #tpu.core_type<tc>} {
    %c0 = arith.constant 0 : index
    %c0_0 = arith.constant 0 : index
    %0 = vector.load %arg0[%c0, %c0_0] : memref<8x16xf32, #tpu.memory_space<vmem>>, vector<8x16xf32>
    %c0_1 = arith.constant 0 : index
    %c0_2 = arith.constant 0 : index
    %1 = vector.load %arg1[%c0_1, %c0_2] : memref<16x128xf32, #tpu.memory_space<vmem>>, vector<16x128xf32>
    %2 = arith.truncf %0 : vector<8x16xf32> to vector<8x16xbf16>
    %3 = arith.truncf %1 : vector<16x128xf32> to vector<16x128xbf16>
    %cst = arith.constant dense<0.000000e+00> : vector<8x128xf32>
    %4 = tpu.matmul %2, %3, %cst {dimension_numbers = #tpu.dot_dimension_numbers<[1], [0], [0], [1], [0, 0, 1, 1], [], []>} : vector<8x16xbf16>, vector<16x128xbf16>, vector<8x128xf32> -> vector<8x128xf32>
    %c0_3 = arith.constant 0 : index
    %c0_4 = arith.constant 0 : index
    %5 = vector.load %arg2[%c0_3, %c0_4] : memref<1x128xf32, #tpu.memory_space<vmem>>, vector<1x128xf32>
    %6 = vector.broadcast %5 : vector<1x128xf32> to vector<8x128xf32>
    %7 = arith.addf %4, %6 : vector<8x128xf32>
    %c0_5 = arith.constant 0 : index
    %c0_6 = arith.constant 0 : index
    %8 = vector.load %arg3[%c0_5, %c0_6] : memref<8x128xf32, #tpu.memory_space<vmem>>, vector<8x128xf32>
    tpu.vector_store %arg3[%c0_5, %c0_6], %7 {strides = array<i32>} : memref<8x128xf32, #tpu.memory_space<vmem>>, vector<8x128xf32>,
    return
  }
}

</mosaic_0001>

<bundles_post_ra>
// kernel: tpu_custom_call.1
= control target key start
LH: loop header
LB: loop body
LE: loop exit
PB: predicated region body
PF: predicated region fallthrough
CT: control target
= control target key end

     0   :  { %8 = vsyncpa [#allocation3], 0  ;;  %s277_s0 = inlined_call_operand.hbm [shape: f32[8,16], index: 0, kind: input, shape index: {}]   ;;  %s278_s1 = inlined_call_operand.hbm [shape: f32[16,128], index: 1, kind: input, shape index: {}]   ;;  %s279_s2 = inlined_call_operand.vmem [shape: f32[1,128], index: 2, kind: input, shape index: {}]   ;;  %s280_s3 = inlined_call_operand.hbm [shape: f32[8,128], index: 3, kind: output, shape index: {}]  }
   0x1   :  { %9 = vsyncpa [#allocation6], 0 }
   0x2   :  { %10 = vsyncpa [#allocation4], 0  ;;  %s204_s12 = smov [#allocation2]   ;;  %s205_s14 = smov [#allocation5]  }
   0x3   :  { %s17_s13 = sshll.u32 %s204_s12, 4  ;;  %s26_s15 = sshll.u32 %s205_s14, 4  ;;  %s18_s13 = int_to_ptr.vmem [resolvable:$true] %s17_s13  ;;  %s231_s15 = int_to_ptr.vmem [resolvable:$true] %s26_s15 }
   0x4   :  { %s132_s18 = scalar_lea.hbm %s277_s0, 128 }
   0x5   :  { %p133_p0 = scmp.ne.s32.totalorder %s277_s0, %s132_s18  ;;  %p136_p1 = scmp.lt.u32.totalorder %s132_s18, %s277_s0 }
   0x7   :  { %p138_p2 = pnand %p136_p1, %p133_p0 }
   0x9   :  { %141 = shalt.err (!%p138_p2)
}
   0xa   :  { %s142_s23 = scalar_lea.vmem %s18_s13, 128  ;;  %p147_p4 = scmp.lt.s32.totalorder %s18_s13, %s18_s13 }
   0xb   :  { %p143_p3 = scmp.ne.s32.totalorder %s18_s13, %s142_s23  ;;  %p148_p5 = scmp.lt.s32.totalorder %s142_s23, %s142_s23 }
   0xd   :  { %p149_p6 = por %p148_p5, %p147_p4 }
   0xf   :  { %p150_p7 = pnand %p149_p6, %p143_p3 }
  0x11   :  { %153 = shalt.err (!%p150_p7)
}
  0x12   :  { %20 = dma.hbm_to_vmem [thread:$0]  %s277_s0, 128, %s18_s13, [#allocation3]  }
  0x13   :  { %s154_s28 = scalar_lea.hbm %s278_s1, 256 }
  0x14   :  { %p155_p8 = scmp.ne.s32.totalorder %s278_s1, %s154_s28  ;;  %p158_p9 = scmp.lt.u32.totalorder %s154_s28, %s278_s1 }
  0x16   :  { %p160_p10 = pnand %p158_p9, %p155_p8 }
  0x18   :  { %163 = shalt.err (!%p160_p10)
}
  0x19   :  { %s164_s6 = scalar_lea.vmem %s231_s15, 256  ;;  %p169_p12 = scmp.lt.s32.totalorder %s231_s15, %s231_s15 }
  0x1a   :  { %p165_p11 = scmp.ne.s32.totalorder %s231_s15, %s164_s6  ;;  %p170_p13 = scmp.lt.s32.totalorder %s164_s6, %s164_s6 }
  0x1c   :  { %p171_p0 = por %p170_p13, %p169_p12 }
  0x1e   :  { %p172_p1 = pnand %p171_p0, %p165_p11 }
  0x20   :  { %175 = shalt.err (!%p172_p1)
}
  0x21   :  { %s206_s0 = smov 128   ;;  %s207_s7 = smov 8  }
  0x22   :  { %32 = dma.hbm_to_vmem [thread:$0]  %s278_s1, 256, %s231_s15, [#allocation6], %s206_s0, %s206_s0, %s207_s7  }
  0x23   :  { %198 = dma.done.wait [#allocation3], 128  }
  0x24   :  { %199 = vsyncadd [#allocation3], 4294967168 }
  0x25   :  { %200 = dma.done.wait [#allocation6], 256  }
  0x26   :  { %201 = vsyncadd [#allocation6], 4294967040  ;;  %v208_v0 = vmov 0.0   ;;  %vm209_vm0 = vmmov 0   ;;  %v43_v1 = vld [vmem:[#allocation5] sm:$0xff]  ;;  %v44_v2 = vld [vmem:[#allocation5 + $0x8] sm:$0xff] }
  0x27   :  { %119 = vmatprep.subr.bf16.mxu0 %v208_v0  ;;  %121 = vmatprep.mubr.msk.bf16.mxu0 %vm209_vm0, %v208_v0  ;;  %v42_v3 = vld [vmem:[#allocation2] sm:$0xff]  ;;  %v46_v4 = vpack.c.bf16 %v44_v2, %v43_v1  ;;  %vm54_vm1 = vcmask 130048   ;;  %s210_s1 = smov [#allocation7]  }
  0x28   :  { %v45_v5 = vpack.c.bf16 %v42_v3, %v42_v3  ;;  %v115_v6 = vld [vmem:[%s279_s2] ss:$0 sm:$0xff]  ;;  %s105_s12 = sshll.u32 %s210_s1, 4  ;;  %s106_s12 = int_to_ptr.vmem [resolvable:$true] %s105_s12 }
  0x29   :  { %120 = vmatpush3.bf16.msra.mxu0 %v46_v4  ;;  %s176_s13 = scalar_lea.vmem %s106_s12, 128  ;;  %p181_p3 = scmp.lt.s32.totalorder %s106_s12, %s106_s12 }
  0x2a   :  { %p177_p2 = scmp.ne.s32.totalorder %s106_s12, %s176_s13  ;;  %p182_p4 = scmp.lt.s32.totalorder %s176_s13, %s176_s13 }
  0x2c   :  { %122 = vmatmul.mubr.msk.bf16.vlgmr.msra.gmra.mrb[0].mxu0 %vm54_vm1, %v45_v5  ;;  %p183_p5 = por %p182_p4, %p181_p3 }
  0x2e   :  { %p184_p6 = pnand %p183_p5, %p177_p2 }
  0xff   :  { %v92_v7 = vpop.f32.mrb[0].mxu0 }
 0x100   :  { %v93_v8 = vadd.f32 %v115_v6, %v92_v7  ;;  %v123_v9 = vpop.f32.mrb[1].mxu0 }
 0x101   :  { %v95_v10 = vpop.f32.mrb[2].mxu0 }
 0x102   :  { %98 = vst [vmem:[#allocation7] sm:$0xff] %v93_v8  ;;  %v124_v11 = vpop.f32.mrb[3].mxu0 }
 0x103   :  { %187 = shalt.err (!%p184_p6)
}
 0x104   :  { %s188_s2 = scalar_lea.hbm %s280_s3, 128 }
 0x105   :  { %p189_p7 = scmp.ne.s32.totalorder %s280_s3, %s188_s2  ;;  %p192_p8 = scmp.lt.u32.totalorder %s188_s2, %s280_s3 }
 0x107   :  { %p194_p9 = pnand %p192_p8, %p189_p7 }
 0x109   :  { %197 = shalt.err (!%p194_p9)
}
 0x10a   :  { %108 = dma.vmem_to_hbm [thread:$0]  %s106_s12, 128, %s280_s3, [#allocation4]  }
 0x10b   :  { %202 = dma.done.wait [#allocation4], 128  }
 0x10c   :  { %203 = vsyncadd [#allocation4], 4294967168 }
 0x10d   :  { %112 = vsyncpa [#allocation3], 1 }
 0x10e   :  { %113 = vsyncpa [#allocation6], 1 }
 0x10f   :  { %114 = vsyncpa [#allocation4], 1 }

</bundles_post_ra>
